<compile_context>
chip_gen: v5e
topology: v5e:2x2
jax: 0.10.0
libtpu: 0.0.40
codegen_flags: <defaults>
</compile_context>

<pallas_src>
import functools

import jax
import jax.numpy as jnp
from jax.experimental import pallas as pl
from jax.experimental.pallas import tpu as pltpu


def _focal_loss_kernel(pred_ref, gt_ref, out_ref, *, gama: float):
    # Block views are (1, C, tile_hw); drop the leading dim so C sits on
    # sublanes and the spatial tile on lanes (lane-dense compute).
    x = pred_ref[0].astype(jnp.float32)          # (C, tile_hw)
    g = gt_ref[0].astype(jnp.float32)            # (C, tile_hw)

    # Numerically stable softmax / log-softmax over the channel (sublane) axis.
    m = jnp.max(x, axis=0, keepdims=True)        # (1, tile_hw)
    shifted = x - m
    e = jnp.exp(shifted)
    denom = jnp.sum(e, axis=0, keepdims=True)    # (1, tile_hw)
    # Exact reciprocal: the kernel is HBM-bandwidth bound so the divide is
    # hidden anyway, and it keeps numerics bit-tight vs. the XLA reference
    # (approx=True would also be safe here since gama uses multiplies below).
    softmax = e * pl.reciprocal(denom, approx=False)
    log_softmax = shifted - jnp.log(denom)

    one_minus = 1.0 - softmax
    # (1 - softmax) ** gama, specialized at trace time: for integer gama
    # (default 2.0) use plain VPU multiplies instead of the exp/log pair that
    # a fractional power would put on the single EUP slot.
    if float(gama) == int(gama) and int(gama) >= 0:
        n = int(gama)
        if n == 0:
            weight = jnp.ones_like(one_minus)
        else:
            weight = one_minus
            for _ in range(n - 1):
                weight = weight * one_minus
    else:
        # Clamp so rounding can't produce a negative base under a fractional
        # exponent (which would be NaN).
        weight = jnp.power(jnp.maximum(one_minus, 0.0), gama)

    loss = -1.0 * weight * g * log_softmax       # important: no detach

    # Independent per-tile partial sum (no cross-step accumulator / serial
    # scalar dependency); the global tree-sum happens in the wrapper.
    out_ref[...] = jnp.sum(loss).reshape(1, 1, 1, 1)


def focal_loss(pred, gt, gama: float = 2.0, tile_hw: int = 8192):
    """Focal loss with softmax over dim=1 (channels); NCHW inputs."""
    N, C, H, W = pred.shape
    HW = H * W

    # Free reshape (no transpose): channels stay in the middle, spatial last.
    p = pred.reshape(N, C, HW)
    g = gt.reshape(N, C, HW)

    # Spatial tile on the lane axis: multiple of 128, capped at (padded) H*W.
    # VMEM per input block = 8 (sublane-padded C) * tile_hw * 4 B; with the
    # default 8192 lanes that is 256 KiB/block -> ~1 MiB with double-buffered
    # inputs, comfortably inside v5e/v6e/v7x scoped-VMEM defaults.
    t_hw = min(tile_hw, pl.cdiv(HW, 128) * 128)
    t_hw = max(128, (t_hw // 128) * 128)
    HW_pad = pl.cdiv(HW, t_hw) * t_hw
    if HW_pad != HW:
        # Padded columns have gt == 0, so they contribute exactly 0 loss.
        p = jnp.pad(p, ((0, 0), (0, 0), (0, HW_pad - HW)))
        g = jnp.pad(g, ((0, 0), (0, 0), (0, HW_pad - HW)))

    num_t = HW_pad // t_hw
    grid = (N, num_t)

    partials = pl.pallas_call(
        functools.partial(_focal_loss_kernel, gama=gama),
        out_shape=jax.ShapeDtypeStruct((N, num_t, 1, 1), jnp.float32),
        grid_spec=pltpu.PrefetchScalarGridSpec(
            num_scalar_prefetch=0,
            grid=grid,
            in_specs=[
                pl.BlockSpec((1, C, t_hw), lambda n, t: (n, 0, t)),
                pl.BlockSpec((1, C, t_hw), lambda n, t: (n, 0, t)),
            ],
            out_specs=pl.BlockSpec((1, 1, 1, 1), lambda n, t: (n, t, 0, 0)),
        ),
        compiler_params=pltpu.CompilerParams(
            dimension_semantics=("parallel", "parallel"),
        ),
    )(p, g)

    # NOTE: if gt is always a one-hot label map, passing int32 labels (and/or
    # bf16 pred) instead of the dense gt tensor would roughly halve HBM traffic.
    mean_loss = jnp.sum(partials) / jnp.float32(N * C * H * W)
    return {"total_loss": mean_loss.astype(pred.dtype)}


def _reference_focal_loss(pred, gt, gama=2.0):
    pred_softmax = jax.nn.softmax(pred, axis=1)
    weight = (1.0 - pred_softmax) ** gama
    loss = -1.0 * weight * gt * jax.nn.log_softmax(pred, axis=1)
    return {"total_loss": loss.mean()}


if __name__ == "__main__":
    key = jax.random.PRNGKey(0)
    k1, k2 = jax.random.split(key)

    N, C, H, W = 2, 4, 16, 16
    pred = jax.random.normal(k1, (N, C, H, W), dtype=jnp.float32)
    # gt as a one-hot label map (typical segmentation target), deterministic.
    labels = jax.random.randint(k2, (N, H, W), 0, C)
    gt = jnp.transpose(
        jax.nn.one_hot(labels, C, dtype=jnp.float32), (0, 3, 1, 2)
    )

    out = focal_loss(pred, gt, gama=2.0)
    jax.block_until_ready(out["total_loss"])

    ref = _reference_focal_loss(pred, gt, gama=2.0)["total_loss"]
    assert jnp.allclose(out["total_loss"], ref, rtol=1e-5, atol=1e-6), (
        out["total_loss"], ref)

    print("KERNEL_OK")
</pallas_src>

<mosaic_0001>
module attributes {stable_mosaic.version = 11 : i64} {
  func.func @_focal_loss_kernel(%arg0: i32, %arg1: i32, %arg2: memref<1x4x256xf32, #tpu.memory_space<vmem>>, %arg3: memref<1x4x256xf32, #tpu.memory_space<vmem>>, %arg4: memref<1x1x1x1xf32, #tpu.memory_space<vmem>>) attributes {dimension_semantics = [#tpu.dimension_semantics<parallel>, #tpu.dimension_semantics<parallel>], iteration_bounds = array<i64: 2, 1>, scalar_prefetch = 0 : i64, scratch_operands = 0 : i64, tpu.core_type = #tpu.core_type<tc>, window_params = [{transform_indices = @transform_0, window_bounds = array<i64: 1, 4, 256>}, {transform_indices = @transform_1, window_bounds = array<i64: 1, 4, 256>}, {transform_indices = @transform_2, window_bounds = array<i64: 1, 1, 1, 1>}]} {
    %c0 = arith.constant 0 : index
    %c0_0 = arith.constant 0 : index
    %c0_1 = arith.constant 0 : index
    %0 = vector.load %arg2[%c0, %c0_0, %c0_1] : memref<1x4x256xf32, #tpu.memory_space<vmem>>, vector<1x4x256xf32>
    %1 = vector.shape_cast %0 : vector<1x4x256xf32> to vector<4x256xf32>
    %c0_2 = arith.constant 0 : index
    %c0_3 = arith.constant 0 : index
    %c0_4 = arith.constant 0 : index
    %2 = vector.load %arg3[%c0_2, %c0_3, %c0_4] : memref<1x4x256xf32, #tpu.memory_space<vmem>>, vector<1x4x256xf32>
    %3 = vector.shape_cast %2 : vector<1x4x256xf32> to vector<4x256xf32>
    %cst = arith.constant dense<0xFF800000> : vector<256xf32>
    %4 = vector.multi_reduction <maximumf>, %1, %cst [0] : vector<4x256xf32> to vector<256xf32>
    %5 = vector.shape_cast %4 : vector<256xf32> to vector<1x256xf32>
    %6 = vector.broadcast %5 : vector<1x256xf32> to vector<4x256xf32>
    %7 = arith.subf %1, %6 : vector<4x256xf32>
    %8 = math.exp %7 : vector<4x256xf32>
    %cst_5 = arith.constant dense<0.000000e+00> : vector<256xf32>
    %9 = vector.multi_reduction <add>, %8, %cst_5 [0] : vector<4x256xf32> to vector<256xf32>
    %10 = vector.shape_cast %9 : vector<256xf32> to vector<1x256xf32>
    %11 = tpu.reciprocal %10 : vector<1x256xf32> -> vector<1x256xf32>
    %12 = vector.broadcast %11 : vector<1x256xf32> to vector<4x256xf32>
    %13 = arith.mulf %8, %12 : vector<4x256xf32>
    %14 = math.log %10 : vector<1x256xf32>
    %15 = vector.broadcast %14 : vector<1x256xf32> to vector<4x256xf32>
    %16 = arith.subf %7, %15 : vector<4x256xf32>
    %cst_6 = arith.constant 1.000000e+00 : f32
    %17 = vector.broadcast %cst_6 : f32 to vector<4x256xf32>
    %18 = arith.subf %17, %13 : vector<4x256xf32>
    %19 = arith.mulf %18, %18 : vector<4x256xf32>
    %cst_7 = arith.constant -1.000000e+00 : f32
    %20 = vector.broadcast %cst_7 : f32 to vector<4x256xf32>
    %21 = arith.mulf %20, %19 : vector<4x256xf32>
    %22 = arith.mulf %21, %3 : vector<4x256xf32>
    %23 = arith.mulf %22, %16 : vector<4x256xf32>
    %24 = vector.shape_cast %23 : vector<4x256xf32> to vector<1x4x256xf32>
    %cst_8 = arith.constant dense<0.000000e+00> : vector<1xf32>
    %25 = vector.multi_reduction <add>, %24, %cst_8 [1, 2] : vector<1x4x256xf32> to vector<1xf32>
    %26 = vector.shape_cast %25 : vector<1xf32> to vector<1x1x1xf32>
    %27 = vector.extract %26[0, 0, 0] : f32 from vector<1x1x1xf32>
    %28 = vector.broadcast %27 : f32 to vector<1x1x1x1xf32>
    %c0_9 = arith.constant 0 : index
    %c0_10 = arith.constant 0 : index
    %c0_11 = arith.constant 0 : index
    %c0_12 = arith.constant 0 : index
    %29 = vector.load %arg4[%c0_9, %c0_10, %c0_11, %c0_12] : memref<1x1x1x1xf32, #tpu.memory_space<vmem>>, vector<1x1x1x1xf32>
    tpu.vector_store %arg4[%c0_9, %c0_10, %c0_11, %c0_12], %28 {strides = array<i32>} : memref<1x1x1x1xf32, #tpu.memory_space<vmem>>, vector<1x1x1x1xf32>,
    return
  }
  func.func @transform_0(%arg0: i32, %arg1: i32) -> (i32, i32, i32) {
    %c0_i32 = arith.constant 0 : i32
    %c0_i32_0 = arith.constant 0 : i32
    return %arg0, %c0_i32, %arg1 : i32, i32, i32
  }
  func.func @transform_1(%arg0: i32, %arg1: i32) -> (i32, i32, i32) {
    %c0_i32 = arith.constant 0 : i32
    %c0_i32_0 = arith.constant 0 : i32
    return %arg0, %c0_i32, %arg1 : i32, i32, i32
  }
  func.func @transform_2(%arg0: i32, %arg1: i32) -> (i32, i32, i32, i32) {
    %c0_i32 = arith.constant 0 : i32
    %c0_i32_0 = arith.constant 0 : i32
    %c0_i32_1 = arith.constant 0 : i32
    return %arg0, %arg1, %c0_i32, %c0_i32_0 : i32, i32, i32, i32
  }
}

</mosaic_0001>

<bundles_post_ra>
// kernel: tpu_custom_call.1
= control target key start
LH: loop header
LB: loop body
LE: loop exit
PB: predicated region body
PF: predicated region fallthrough
CT: control target
= control target key end

     0   :  { %7 = vsyncpa [#allocation3], 0  ;;  %s788_s0 = inlined_call_operand.hbm [shape: f32[2,4,256], index: 0, kind: input, shape index: {}]   ;;  %s789_s1 = inlined_call_operand.hbm [shape: f32[2,4,256], index: 1, kind: input, shape index: {}]   ;;  %s790_s2 = inlined_call_operand.vmem [shape: f32[2,1,1,1], index: 2, kind: output, shape index: {}]  }
   0x1   :  { %9 = vsyncpa [#allocation3 + $0x1], 0 }
   0x2   :  { %10 = vsyncpa [#allocation5], 0 }
   0x3   :  { %12 = vsyncpa [#allocation5 + $0x1], 0  ;;  %s677_s9 = smov 0   ;;  %s679_s10 = smov 0  }
   0x4   :  { %s681_s11 = smov 0   ;;  %s683_s12 = smov 0  }
   0x5   :  { %s685_s13 = smov 0   ;;  %s687_s14 = smov 0  }
   0x6 LB: > { %s457_s15 = sadd.s32 4294967295, %s660_s14   ;;  %s30_s16 = sadd.s32 1, %s656_s13  ;;  %s660_s14 = sphi %s687_s14, %s18_s14   ;;  %s656_s13 = sphi %s685_s13, %s797_s13   ;;  %s652_s12 = sphi %s683_s12, %s796_s12   ;;  %s648_s11 = sphi %s681_s11, %s795_s11   ;;  %s644_s10 = sphi %s679_s10, %s794_s10   ;;  %s640_s9 = sphi %s677_s9, %s793_s9  }
   0x7   : > { %p32_p0 = scmp.ge.s32.totalorder %s30_s16, 2  ;;  %s39_s17 = sadd.s32 1, %s648_s11 }
   0x8   : > { %p46_p1 = scmp.ne.s32.totalorder %s648_s11, %s644_s10  ;;  %p47_p2 = scmp.eq.s32.totalorder %s660_s14, 0 }
   0x9   : > { %s799_s16 = smov (%p32_p0, %s30_s16), 0  ;;  %p52_p4 = scmp.ne.s32.totalorder %s644_s10, %s640_s9 }
   0xa   : > { %p713_p3 = por %p47_p2, %p46_p1  ;;  %s34_s19 = ssub.s32 %s656_s13, %s799_s16 }
   0xb   : > { %p53_p5 = scmp.eq.s32.totalorder %s457_s15, 0  ;;  %p37_p6 = scmp.eq.s32.totalorder %s34_s19, 0 }
   0xc   : > { %p487_p8 = scmp.lt.s32.totalorder %s660_s14, 2  ;;  %s132_s22 = sand.u32 1, %s648_s11  }
   0xd   : > { %p720_p7 = por %p53_p5, %p52_p4  ;;  %s472_s23 = sshll.u32 %s656_s13, 3 }
   0xe   : > { %s726_s21 = scalar_select %p37_p6, %s648_s11, %s39_s17  }
   0xf   : > { %s461_s24 = sshll.u32 %s132_s22, 3  ;;  %s143_s27 = scalar_lea.hbm %s788_s0, %s472_s23 }
  0x10   : > { %s145_s28 = sshll.u32 %s143_s27, 4  ;;  %s136_s29 = scalar_lea.vmem [#allocation2], %s461_s24  ;;  %s146_s28 = int_to_ptr.hbm [resolvable:$true] %s145_s28 }
  0x11   : > { %s147_s30 = sshll.u32 %s136_s29, 4  ;;  %p481_p9 = pnand %p487_p8, %p713_p3  ;;  %s148_s30 = int_to_ptr.vmem [resolvable:$true] %s147_s30 }
  0x12   : > { %p467_p10 = scmp.ge.s32.totalorder %s660_s14, 1  ;;  %p174_p11 = scmp.lt.s32.totalorder %s660_s14, 3 }
  0x13   : > { %s133_s3 = scalar_lea.sflag [#allocation3], %s132_s22  ;;  %s165_s6 = scalar_lea.hbm %s789_s1, %s472_s23 }
  0x14   : > { %483 = dma.hbm_to_vmem [thread:$0]  (!%p481_p9), %s146_s28, 128, %s148_s30, %s133_s3  }
  0x15   : > { %p175_p12 = pnand %p467_p10, %p174_p11  ;;  %s167_s7 = sshll.u32 %s165_s6, 4  ;;  %s168_s7 = int_to_ptr.hbm [resolvable:$true] %s167_s7 }
  0x16   : > { %s158_s8 = scalar_lea.vmem [#allocation4], %s461_s24  ;;  %s155_s15 = scalar_lea.sflag [#allocation5], %s132_s22 }
  0x17   : > { %s169_s9 = sshll.u32 %s158_s8, 4  ;;  %178 = sbr.rel (%p175_p12) target bundleno = 312 (0x138), region = 28  ;;  %s170_s9 = int_to_ptr.vmem [resolvable:$true] %s169_s9 }
  0x18   : > { %486 = dma.hbm_to_vmem [thread:$0]  (!%p481_p9), %s168_s7, 128, %s170_s9, %s155_s15  }
  0x19   : > { %s180_s17 = sand.u32 (!%p175_p12), 1, %s644_s10  }
  0x1a   : > { %s468_s18 = sshll.u32 (!%p175_p12), %s180_s17, 3  ;;  %s181_s19 = scalar_lea.sflag (!%p175_p12), [#allocation3], %s180_s17 }
  0x1b   : > { %s184_s25 = scalar_lea.vmem (!%p175_p12), [#allocation2], %s468_s18 }
  0x1c   : > { %631 = dma.done.wait (%p720_p7), %s181_s19, 128  }
  0x1d   : > { %633 = vsyncadd (%p720_p7), %s181_s19, 4294967168  ;;  %s191_s23 = scalar_lea.sflag [#allocation5], %s180_s17  ;;  %s745_s24 = scalar_lea.vmem [#allocation4], %s468_s18 }
  0x1e   : > { %635 = dma.done.wait (%p720_p7), %s191_s23, 128  }
  0x1f   : > { %637 = vsyncadd (%p720_p7), %s191_s23, 4294967168  ;;  %v230_v0 = vld [vmem:[%s184_s25] sm:$0xff]  ;;  %vm238_vm0 = vcmask 1043456   ;;  %p224_p13 = scmp.lt.s32.totalorder %s652_s12, 1  ;;  %vm349_vm9 = vcmask 0  }
  0x20   : > { %233 = vst [vmem:[#allocation1] ss:$2 sm:$0xff] %v230_v0 }
  0x21   : > { %s801_s12 = smov (!%p224_p13, %s652_s12), 1 }
  0x22   : > { %s229_s26 = scalar_lea.vmem %s790_s2, %s801_s12 }
  0x27   : > { %v234_v1 = vld.sshfl [vmem:[#allocation1] sm:$0xff pattern:$0x75316420]  ;;  %v235_v2 = vld.sshfl [vmem:[#allocation1 + $0x8] sm:$0xff pattern:$0x75316420] }
  0x28   : > { %v239_v3 = vsel %vm238_vm0, %v234_v1, -inf  ;;  %v246_v4 = vsel %vm238_vm0, %v235_v2, -inf }
  0x29   : > { %v240_v5 = vrot.slane %v239_v3, 4  ;;  %v247_v6 = vrot.slane %v246_v4, 4 }
  0x2b   : > { %v241_v7 = vmax.f32 %v239_v3, %v240_v5  ;;  %v248_v8 = vmax.f32 %v246_v4, %v247_v6  ;;  %v231_v5 = vld [vmem:[%s745_s24] sm:$0xff] }
  0x2d   : > { %v242_v9 = vrot.slane %v241_v7, 2  ;;  %v249_v10 = vrot.slane %v248_v8, 2 }
  0x2f   : > { %v243_v11 = vmax.f32 %v241_v7, %v242_v9  ;;  %v250_v12 = vmax.f32 %v248_v8, %v249_v10 }
  0x31   : > { %v244_v13 = vrot.slane %v243_v11, 1  ;;  %v251_v14 = vrot.slane %v250_v12, 1 }
  0x33   : > { %v245_v15 = vmax.f32 %v243_v11, %v244_v13  ;;  %v252_v16 = vmax.f32 %v250_v12, %v251_v14 }
  0x35   : > { %v255_v17 = vrot.slane %v252_v16, 4 }
  0x37   : > { %v256_v18 = vsel %vm238_vm0, %v245_v15, %v255_v17 }
  0x38   : > { %v754_v19 = vsub.f32 %v230_v0, %v256_v18 }
  0x3a   : > { %v259_v20 = vmul.f32 1.442695, %v754_v19 }
  0x3c   : > { %536 = vpow2.f32 %v259_v20 }
  0x42   : > { %v537_v21 = vpop.eup %536 }
  0x43   : > { %262 = vst [vmem:[#allocation1] ss:$2 sm:$0xff] %v537_v21 }
  0x4a   : > { %v263_v22 = vld.sshfl [vmem:[#allocation1] sm:$0xff pattern:$0x75316420]  ;;  %v264_v23 = vld.sshfl [vmem:[#allocation1 + $0x8] sm:$0xff pattern:$0x75316420] }
  0x4b   : > { %v267_v24 = vsel %vm238_vm0, %v263_v22, 0.0  ;;  %v274_v25 = vsel %vm238_vm0, %v264_v23, 0.0 }
  0x4c   : > { %v268_v26 = vrot.slane %v267_v24, 4  ;;  %v275_v27 = vrot.slane %v274_v25, 4 }
  0x4e   : > { %v269_v28 = vadd.f32 %v268_v26, %v267_v24  ;;  %v276_v29 = vadd.f32 %v275_v27, %v274_v25 }
  0x50   : > { %v270_v30 = vrot.slane %v269_v28, 2  ;;  %v277_v31 = vrot.slane %v276_v29, 2 }
  0x52   : > { %v271_v32 = vadd.f32 %v270_v30, %v269_v28  ;;  %v278_v33 = vadd.f32 %v277_v31, %v276_v29 }
  0x54   : > { %v272_v34 = vrot.slane %v271_v32, 1  ;;  %v279_v35 = vrot.slane %v278_v33, 1 }
  0x56   : > { %v273_v36 = vadd.f32 %v272_v34, %v271_v32  ;;  %v280_v37 = vadd.f32 %v279_v35, %v278_v33 }
  0x58   : > { %538 = vrcp.f32 %v273_v36  ;;  %vm286_vm1 = vweird.f32 %v273_v36  ;;  %v290_v41 = vand.u32 2147483647, %v273_v36  ;;  %v292_v44 = vand.u32 2147483648, %v273_v36 }
  0x59   : > { %540 = vrcp.f32 %v280_v37  ;;  %v306_v45 = vand.u32 2147483648, %v280_v37  ;;  %vm300_vm3 = vweird.f32 %v280_v37  ;;  %v304_v47 = vand.u32 2147483647, %v280_v37 }
  0x5a   : > { %542 = vlog2.f32 %v280_v37  ;;  %v293_v52 = vor.u32 1.1754944e-38, %v292_v44  ;;  %vm291_vm7 = vcmp.eq.f32.partialorder %v290_v41, 8.507059e+37 }
  0x5b   : > { %544 = vlog2.f32 %v273_v36  ;;  %v307_v53 = vor.u32 1.1754944e-38, %v306_v45  ;;  %vm305_vm8 = vcmp.eq.f32.partialorder %v304_v47, 8.507059e+37 }
  0x5e   : > { %v539_v38 = vpop.eup %538 }
  0x5f   : > { %v541_v39 = vpop.eup %540  ;;  %v282_v40 = vmul.f32 %v539_v38, %v273_v36  ;;  %vm287_vm2 = vweird.f32 %v539_v38 }
  0x60   : > { %v296_v42 = vmul.f32 %v541_v39, %v280_v37  ;;  %vm301_vm4 = vweird.f32 %v541_v39  ;;  %vm288_vm5 = vmor %vm286_vm1, %vm287_vm2  ;;  %v543_v50 = vpop.eup %542 }
  0x61   : > { %v283_v43 = vsub.f32 1.0, %v282_v40  ;;  %vm302_vm6 = vmor %vm300_vm3, %vm301_vm4  ;;  %v318_v57 = vmul.f32 0.6931472, %v543_v50  ;;  %v545_v58 = vpop.eup %544 }
  0x62   : > { %v297_v46 = vsub.f32 1.0, %v296_v42  ;;  %v316_v63 = vmul.f32 0.6931472, %v545_v58 }
  0x63   : > { %v284_v48 = vmul.f32 %v539_v38, %v283_v43  ;;  %v321_v0 = vrot.slane %v318_v57, 4 }
  0x64   : > { %v298_v49 = vmul.f32 %v541_v39, %v297_v46 }
  0x65   : > { %v285_v51 = vadd.f32 %v539_v38, %v284_v48  ;;  %v322_v3 = vsel %vm238_vm0, %v316_v63, %v321_v0 }
  0x66   : > { %v299_v54 = vadd.f32 %v541_v39, %v298_v49  ;;  %v324_v6 = vsub.f32 %v754_v19, %v322_v3 }
  0x67   : > { %v289_v55 = vsel %vm288_vm5, %v539_v38, %v285_v51 }
  0x68   : > { %v303_v56 = vsel %vm302_vm6, %v541_v39, %v299_v54  ;;  %v294_v59 = vsel %vm291_vm7, %v293_v52, %v289_v55 }
  0x69   : > { %v308_v60 = vsel %vm305_vm8, %v307_v53, %v303_v56 }
  0x6a   : > { %v311_v61 = vrot.slane %v308_v60, 4 }
  0x6c   : > { %v312_v62 = vsel %vm238_vm0, %v294_v59, %v311_v61 }
  0x6d   : > { %v314_v1 = vmul.f32 %v537_v21, %v312_v62 }
  0x6f   : > { %v325_v2 = vsub.f32 1.0, %v314_v1 }
  0x71   : > { %v326_v4 = vmul.f32 %v325_v2, %v325_v2 }
  0x73   : > { %v327_v7 = vmul.f32 -1.0, %v326_v4 }
  0x75   : > { %v328_v8 = vmul.f32 %v327_v7, %v231_v5 }
  0x77   : > { %v329_v9 = vmul.f32 %v328_v8, %v324_v6 }
  0x79   : > { %331 = vst [vmem:[#allocation1] ss:$2 sm:$0xff] %v329_v9 }
  0x80   : > { %v332_v10 = vld.sshfl [vmem:[#allocation1] sm:$0xff pattern:$0x75316420]  ;;  %v333_v11 = vld.sshfl [vmem:[#allocation1 + $0x8] sm:$0xff pattern:$0x75316420] }
  0x81   : > { %v336_v12 = vsel %vm238_vm0, %v332_v10, 0.0  ;;  %v337_v13 = vsel %vm238_vm0, %v333_v11, 0.0 }
  0x82   : > { %v338_v14 = vadd.f32 %v337_v13, %v336_v12 }
  0x84   : > { %339 = vadd.xlane.f32.xlu0 %v338_v14 }
  0xf7   : > { %v340_v15 = vpop.xlane.xlu0 %339 }
  0xf8   : > { %v341_v16 = vrot.slane %v340_v15, 4 }
  0xfa   : > { %v342_v17 = vadd.f32 %v341_v16, %v340_v15 }
  0xfc   : > { %v343_v18 = vrot.slane %v342_v17, 2 }
  0xfe   : > { %v344_v20 = vadd.f32 %v343_v18, %v342_v17 }
 0x100   : > { %v345_v19 = vrot.slane %v344_v20, 1 }
 0x102   : > { %v346_v21 = vadd.f32 %v345_v19, %v344_v20 }
 0x104   : > { %474 = vpush %v346_v21 }
 0x135   : > { %s475_s27 = spop %474 }
 0x136   : > { %v348_v22 = vstv %s475_s27 }
 0x137   : > { %350 = vst.msk [vmem:[%s229_s26] sm:$0x1] %vm349_vm9, %v348_v22 }
 0x138 PF: > { %s18_s14 = sadd.s32 1, %s660_s14   ;;  %s793_s9 = smov %s644_s10 }
 0x139   : > { %p15_p0 = scmp.ge.s32.totalorder %s18_s14, 4   ;;  %s794_s10 = smov %s648_s11 }
 0x13a   : > { %s795_s11 = smov %s726_s21  ;;  %s796_s12 = smov %s656_s13 }
 0x13b   : > { %s797_s13 = smov %s799_s16  ;;  %17 = sbr.rel (!%p15_p0) target bundleno = 6 (0x6), region = 81 }
 0x140   :  { %374 = vsyncpa [#allocation3], 1 }
 0x141   :  { %376 = vsyncpa [#allocation3 + $0x1], 1 }
 0x142   :  { %377 = vsyncpa [#allocation5], 1 }
 0x143   :  { %379 = vsyncpa [#allocation5 + $0x1], 1 }

</bundles_post_ra>
